<compile_context>
chip_gen: v5e
topology: v5e:2x2
jax: 0.10.0
libtpu: 0.0.40
codegen_flags: <defaults>
</compile_context>

<pallas_src>
import functools

import jax
import jax.numpy as jnp
from jax.experimental import pallas as pl
from jax.experimental.pallas import tpu as pltpu

_H0 = 128   # padded hidden 0 (real 100)
_H1 = 128   # padded hidden 1 (real 50)
_NC = 128   # padded class dim (real num_cls)


def modelc_kernel(x_ref, w0_ref, b0_ref, w1_ref, b1_ref, w2_ref, b2_ref,
                  m0_ref, m1_ref, o_ref, *, num_cls):
    x = x_ref[...]

    # fc0 + ReLU + dropout (inverted-dropout mask precomputed, values {0, 1/(1-p)})
    h = jnp.dot(x, w0_ref[...], preferred_element_type=jnp.float32) + b0_ref[...]
    h = jnp.maximum(h, 0.0)
    h = h * m0_ref[...]

    # fc1 + ReLU + dropout
    h = jnp.dot(h, w1_ref[...], preferred_element_type=jnp.float32) + b1_ref[...]
    h = jnp.maximum(h, 0.0)
    h = h * m1_ref[...]

    # fc2 + ReLU
    h = jnp.dot(h, w2_ref[...], preferred_element_type=jnp.float32) + b2_ref[...]
    h = jnp.maximum(h, 0.0)

    # Mask padded class columns so they don't corrupt the softmax denominator.
    col = jax.lax.broadcasted_iota(jnp.int32, h.shape, 1)
    h = jnp.where(col < num_cls, h, -jnp.inf)

    # Stable log_softmax over the class axis (torch default dim=1 for 2-D input).
    m = jnp.max(h, axis=-1, keepdims=True)
    s = h - m
    lse = jnp.log(jnp.sum(jnp.exp(s), axis=-1, keepdims=True))
    o_ref[...] = (s - lse).astype(o_ref.dtype)


def init_params(key, image_size, num_cls=10):
    """Deterministic xavier-uniform init (matches ModelC.init_xavier shapes)."""
    def xavier(k, fan_out, fan_in):
        limit = jnp.sqrt(6.0 / (fan_in + fan_out))
        return jax.random.uniform(k, (fan_out, fan_in), jnp.float32, -limit, limit)

    k0, k1, k2 = jax.random.split(key, 3)
    return {
        "w0": xavier(k0, 100, image_size), "b0": jnp.zeros((100,), jnp.float32),
        "w1": xavier(k1, 50, 100),         "b1": jnp.zeros((50,), jnp.float32),
        "w2": xavier(k2, num_cls, 50),     "b2": jnp.zeros((num_cls,), jnp.float32),
    }


def _round_up(a, b):
    return (a + b - 1) // b * b


def _pad2(a, shape):
    out = jnp.zeros(shape, jnp.float32)
    return out.at[:a.shape[0], :a.shape[1]].set(a.astype(jnp.float32))


def modelc_forward(x, params, image_size, *, key=None,
                   dropouts_p=(0.5, 0.1), training=True):
    x2 = x.reshape(-1, image_size).astype(jnp.float32)
    B = x2.shape[0]
    num_cls = params["w2"].shape[0]

    # Pre-transpose + zero-pad weights/biases to lane-dense (multiple-of-128) dims.
    w0t = _pad2(params["w0"].T, (image_size, _H0))
    w1t = _pad2(params["w1"].T, (_H0, _H1))
    w2t = _pad2(params["w2"].T, (_H1, _NC))
    b0 = _pad2(params["b0"].reshape(1, -1), (1, _H0))
    b1 = _pad2(params["b1"].reshape(1, -1), (1, _H1))
    b2 = _pad2(params["b2"].reshape(1, -1), (1, _NC))

    # Batch tiling: tiles must be a multiple of 8 rows; pad B up to a tile multiple.
    TB = min(512, _round_up(B, 8))
    Bp = _round_up(B, TB)
    if Bp != B:
        x2 = jnp.pad(x2, ((0, Bp - B), (0, 0)))

    # Inverted-dropout masks (training=True semantics of F.dropout), built with
    # jax.random on the host side and streamed as per-tile inputs.
    # TODO(synk): PyTorch's F.dropout RNG stream cannot be bit-reproduced; same
    # inverted-dropout semantics, different random stream.
    if training:
        if key is None:
            key = jax.random.PRNGKey(0)
        k0, k1 = jax.random.split(key)
        m0 = (jax.random.bernoulli(k0, 1.0 - dropouts_p[0], (Bp, _H0))
              .astype(jnp.float32) * jnp.float32(1.0 / (1.0 - dropouts_p[0])))
        m1 = (jax.random.bernoulli(k1, 1.0 - dropouts_p[1], (Bp, _H1))
              .astype(jnp.float32) * jnp.float32(1.0 / (1.0 - dropouts_p[1])))
    else:
        m0 = jnp.ones((Bp, _H0), jnp.float32)
        m1 = jnp.ones((Bp, _H1), jnp.float32)

    n_tiles = Bp // TB

    def batch_spec(cols):
        return pl.BlockSpec((TB, cols), lambda i: (i, 0))

    def resident_spec(shape):
        return pl.BlockSpec(shape, lambda i: (0, 0))

    kernel = functools.partial(modelc_kernel, num_cls=num_cls)

    flops = 2 * Bp * (image_size * _H0 + _H0 * _H1 + _H1 * _NC)
    bytes_accessed = (x2.size + w0t.size + w1t.size + w2t.size
                      + m0.size + m1.size + Bp * _NC) * 4
    cost = pl.CostEstimate(flops=flops,
                           transcendentals=Bp * (_NC + 1),
                           bytes_accessed=bytes_accessed)

    out = pl.pallas_call(
        kernel,
        out_shape=jax.ShapeDtypeStruct((Bp, _NC), jnp.float32),
        grid=(n_tiles,),
        in_specs=[
            batch_spec(image_size),
            resident_spec((image_size, _H0)), resident_spec((1, _H0)),
            resident_spec((_H0, _H1)),        resident_spec((1, _H1)),
            resident_spec((_H1, _NC)),        resident_spec((1, _NC)),
            batch_spec(_H0), batch_spec(_H1),
        ],
        out_specs=batch_spec(_NC),
        compiler_params=pltpu.CompilerParams(
            dimension_semantics=("parallel",)),
        cost_estimate=cost,
    )(x2, w0t, b0, w1t, b1, w2t, b2, m0, m1)

    # Slice off batch padding and padded class columns.
    return out[:B, :num_cls]


if __name__ == "__main__":
    # Small shapes: batch=2, 1 channel, 16x16 image -> image_size = 256
    B, C, H, W = 2, 1, 16, 16
    image_size = C * H * W
    num_cls = 10

    key = jax.random.PRNGKey(0)
    kx, kp, kd = jax.random.split(key, 3)
    x = jax.random.normal(kx, (B, C, H, W), jnp.float32)
    params = init_params(kp, image_size, num_cls)

    out = modelc_forward(x, params, image_size, key=kd,
                         dropouts_p=(0.5, 0.1), training=True)
    out = jax.block_until_ready(out)
    assert out.shape == (B, num_cls)
    assert bool(jnp.all(jnp.isfinite(out)))
    print("KERNEL_OK")
</pallas_src>

<mosaic_0001>
module attributes {stable_mosaic.version = 11 : i64} {
  func.func @modelc_kernel(%arg0: i32, %arg1: memref<8x256xf32, #tpu.memory_space<vmem>>, %arg2: memref<256x128xf32, #tpu.memory_space<vmem>>, %arg3: memref<1x128xf32, #tpu.memory_space<vmem>>, %arg4: memref<128x128xf32, #tpu.memory_space<vmem>>, %arg5: memref<1x128xf32, #tpu.memory_space<vmem>>, %arg6: memref<128x128xf32, #tpu.memory_space<vmem>>, %arg7: memref<1x128xf32, #tpu.memory_space<vmem>>, %arg8: memref<8x128xf32, #tpu.memory_space<vmem>>, %arg9: memref<8x128xf32, #tpu.memory_space<vmem>>, %arg10: memref<8x128xf32, #tpu.memory_space<vmem>>) attributes {dimension_semantics = [#tpu.dimension_semantics<parallel>], iteration_bounds = array<i64: 1>, scalar_prefetch = 0 : i64, scratch_operands = 0 : i64, tpu.core_type = #tpu.core_type<tc>, window_params = [{transform_indices = @transform_0, window_bounds = array<i64: 8, 256>}, {pipeline_mode = #tpu.pipeline_mode<synchronous>, transform_indices = @transform_1, window_bounds = array<i64: 256, 128>}, {pipeline_mode = #tpu.pipeline_mode<synchronous>, transform_indices = @transform_2, window_bounds = array<i64: 1, 128>}, {pipeline_mode = #tpu.pipeline_mode<synchronous>, transform_indices = @transform_3, window_bounds = array<i64: 128, 128>}, {pipeline_mode = #tpu.pipeline_mode<synchronous>, transform_indices = @transform_4, window_bounds = array<i64: 1, 128>}, {pipeline_mode = #tpu.pipeline_mode<synchronous>, transform_indices = @transform_5, window_bounds = array<i64: 128, 128>}, {pipeline_mode = #tpu.pipeline_mode<synchronous>, transform_indices = @transform_6, window_bounds = array<i64: 1, 128>}, {transform_indices = @transform_7, window_bounds = array<i64: 8, 128>}, {transform_indices = @transform_8, window_bounds = array<i64: 8, 128>}, {transform_indices = @transform_9, window_bounds = array<i64: 8, 128>}]} {
    %c0 = arith.constant 0 : index
    %c0_0 = arith.constant 0 : index
    %0 = vector.load %arg1[%c0, %c0_0] : memref<8x256xf32, #tpu.memory_space<vmem>>, vector<8x256xf32>
    %c0_1 = arith.constant 0 : index
    %c0_2 = arith.constant 0 : index
    %1 = vector.load %arg2[%c0_1, %c0_2] : memref<256x128xf32, #tpu.memory_space<vmem>>, vector<256x128xf32>
    %cst = arith.constant dense<0.000000e+00> : vector<8x128xf32>
    %2 = tpu.matmul %0, %1, %cst {dimension_numbers = #tpu.dot_dimension_numbers<[1], [0], [0], [1], [0, 0, 1, 1], [], []>} : vector<8x256xf32>, vector<256x128xf32>, vector<8x128xf32> -> vector<8x128xf32>
    %c0_3 = arith.constant 0 : index
    %c0_4 = arith.constant 0 : index
    %3 = vector.load %arg3[%c0_3, %c0_4] : memref<1x128xf32, #tpu.memory_space<vmem>>, vector<1x128xf32>
    %4 = vector.broadcast %3 : vector<1x128xf32> to vector<8x128xf32>
    %5 = arith.addf %2, %4 : vector<8x128xf32>
    %cst_5 = arith.constant 0.000000e+00 : f32
    %6 = vector.broadcast %cst_5 : f32 to vector<8x128xf32>
    %7 = arith.maximumf %5, %6 : vector<8x128xf32>
    %c0_6 = arith.constant 0 : index
    %c0_7 = arith.constant 0 : index
    %8 = vector.load %arg8[%c0_6, %c0_7] : memref<8x128xf32, #tpu.memory_space<vmem>>, vector<8x128xf32>
    %9 = arith.mulf %7, %8 : vector<8x128xf32>
    %c0_8 = arith.constant 0 : index
    %c0_9 = arith.constant 0 : index
    %10 = vector.load %arg4[%c0_8, %c0_9] : memref<128x128xf32, #tpu.memory_space<vmem>>, vector<128x128xf32>
    %cst_10 = arith.constant dense<0.000000e+00> : vector<8x128xf32>
    %11 = tpu.matmul %9, %10, %cst_10 {dimension_numbers = #tpu.dot_dimension_numbers<[1], [0], [0], [1], [0, 0, 1, 1], [], []>} : vector<8x128xf32>, vector<128x128xf32>, vector<8x128xf32> -> vector<8x128xf32>
    %c0_11 = arith.constant 0 : index
    %c0_12 = arith.constant 0 : index
    %12 = vector.load %arg5[%c0_11, %c0_12] : memref<1x128xf32, #tpu.memory_space<vmem>>, vector<1x128xf32>
    %13 = vector.broadcast %12 : vector<1x128xf32> to vector<8x128xf32>
    %14 = arith.addf %11, %13 : vector<8x128xf32>
    %cst_13 = arith.constant 0.000000e+00 : f32
    %15 = vector.broadcast %cst_13 : f32 to vector<8x128xf32>
    %16 = arith.maximumf %14, %15 : vector<8x128xf32>
    %c0_14 = arith.constant 0 : index
    %c0_15 = arith.constant 0 : index
    %17 = vector.load %arg9[%c0_14, %c0_15] : memref<8x128xf32, #tpu.memory_space<vmem>>, vector<8x128xf32>
    %18 = arith.mulf %16, %17 : vector<8x128xf32>
    %c0_16 = arith.constant 0 : index
    %c0_17 = arith.constant 0 : index
    %19 = vector.load %arg6[%c0_16, %c0_17] : memref<128x128xf32, #tpu.memory_space<vmem>>, vector<128x128xf32>
    %cst_18 = arith.constant dense<0.000000e+00> : vector<8x128xf32>
    %20 = tpu.matmul %18, %19, %cst_18 {dimension_numbers = #tpu.dot_dimension_numbers<[1], [0], [0], [1], [0, 0, 1, 1], [], []>} : vector<8x128xf32>, vector<128x128xf32>, vector<8x128xf32> -> vector<8x128xf32>
    %c0_19 = arith.constant 0 : index
    %c0_20 = arith.constant 0 : index
    %21 = vector.load %arg7[%c0_19, %c0_20] : memref<1x128xf32, #tpu.memory_space<vmem>>, vector<1x128xf32>
    %22 = vector.broadcast %21 : vector<1x128xf32> to vector<8x128xf32>
    %23 = arith.addf %20, %22 : vector<8x128xf32>
    %cst_21 = arith.constant 0.000000e+00 : f32
    %24 = vector.broadcast %cst_21 : f32 to vector<8x128xf32>
    %25 = arith.maximumf %23, %24 : vector<8x128xf32>
    %26 = tpu.iota {dimensions = array<i32: 1>} : vector<8x128xi32>
    %c10_i32 = arith.constant 10 : i32
    %27 = vector.broadcast %c10_i32 : i32 to vector<8x128xi32>
    %28 = arith.cmpi slt, %26, %27 : vector<8x128xi32>
    %cst_22 = arith.constant 0xFF800000 : f32
    %29 = vector.broadcast %cst_22 : f32 to vector<8x128xf32>
    %30 = arith.select %28, %25, %29 : vector<8x128xi1>, vector<8x128xf32>
    %cst_23 = arith.constant dense<0xFF800000> : vector<8xf32>
    %31 = vector.multi_reduction <maximumf>, %30, %cst_23 [1] : vector<8x128xf32> to vector<8xf32>
    %32 = vector.shape_cast %31 : vector<8xf32> to vector<8x1xf32>
    %33 = vector.broadcast %32 : vector<8x1xf32> to vector<8x128xf32>
    %34 = arith.subf %30, %33 : vector<8x128xf32>
    %35 = math.exp %34 : vector<8x128xf32>
    %cst_24 = arith.constant dense<0.000000e+00> : vector<8xf32>
    %36 = vector.multi_reduction <add>, %35, %cst_24 [1] : vector<8x128xf32> to vector<8xf32>
    %37 = vector.shape_cast %36 : vector<8xf32> to vector<8x1xf32>
    %38 = math.log %37 : vector<8x1xf32>
    %39 = vector.broadcast %38 : vector<8x1xf32> to vector<8x128xf32>
    %40 = arith.subf %34, %39 : vector<8x128xf32>
    %c0_25 = arith.constant 0 : index
    %c0_26 = arith.constant 0 : index
    %41 = vector.load %arg10[%c0_25, %c0_26] : memref<8x128xf32, #tpu.memory_space<vmem>>, vector<8x128xf32>
    tpu.vector_store %arg10[%c0_25, %c0_26], %40 {strides = array<i32>} : memref<8x128xf32, #tpu.memory_space<vmem>>, vector<8x128xf32>,
    return
  }
  func.func @transform_0(%arg0: i32) -> (i32, i32) {
    %c0_i32 = arith.constant 0 : i32
    %c0_i32_0 = arith.constant 0 : i32
    return %arg0, %c0_i32 : i32, i32
  }
  func.func @transform_1(%arg0: i32) -> (i32, i32) {
    %c0_i32 = arith.constant 0 : i32
    %c0_i32_0 = arith.constant 0 : i32
    %c0_i32_1 = arith.constant 0 : i32
    return %c0_i32, %c0_i32_0 : i32, i32
  }
  func.func @transform_2(%arg0: i32) -> (i32, i32) {
    %c0_i32 = arith.constant 0 : i32
    %c0_i32_0 = arith.constant 0 : i32
    %c0_i32_1 = arith.constant 0 : i32
    return %c0_i32, %c0_i32_0 : i32, i32
  }
  func.func @transform_3(%arg0: i32) -> (i32, i32) {
    %c0_i32 = arith.constant 0 : i32
    %c0_i32_0 = arith.constant 0 : i32
    %c0_i32_1 = arith.constant 0 : i32
    return %c0_i32, %c0_i32_0 : i32, i32
  }
  func.func @transform_4(%arg0: i32) -> (i32, i32) {
    %c0_i32 = arith.constant 0 : i32
    %c0_i32_0 = arith.constant 0 : i32
    %c0_i32_1 = arith.constant 0 : i32
    return %c0_i32, %c0_i32_0 : i32, i32
  }
  func.func @transform_5(%arg0: i32) -> (i32, i32) {
    %c0_i32 = arith.constant 0 : i32
    %c0_i32_0 = arith.constant 0 : i32
    %c0_i32_1 = arith.constant 0 : i32
    return %c0_i32, %c0_i32_0 : i32, i32
  }
  func.func @transform_6(%arg0: i32) -> (i32, i32) {
    %c0_i32 = arith.constant 0 : i32
    %c0_i32_0 = arith.constant 0 : i32
    %c0_i32_1 = arith.constant 0 : i32
    return %c0_i32, %c0_i32_0 : i32, i32
  }
  func.func @transform_7(%arg0: i32) -> (i32, i32) {
    %c0_i32 = arith.constant 0 : i32
    %c0_i32_0 = arith.constant 0 : i32
    return %arg0, %c0_i32 : i32, i32
  }
  func.func @transform_8(%arg0: i32) -> (i32, i32) {
    %c0_i32 = arith.constant 0 : i32
    %c0_i32_0 = arith.constant 0 : i32
    return %arg0, %c0_i32 : i32, i32
  }
  func.func @transform_9(%arg0: i32) -> (i32, i32) {
    %c0_i32 = arith.constant 0 : i32
    %c0_i32_0 = arith.constant 0 : i32
    return %arg0, %c0_i32 : i32, i32
  }
}

</mosaic_0001>

<bundles_post_ra>
// kernel: tpu_custom_call.1
= control target key start
LH: loop header
LB: loop body
LE: loop exit
PB: predicated region body
PF: predicated region fallthrough
CT: control target
= control target key end

     0   :  { %14 = vsyncpa [#allocation3], 0  ;;  %s604_s0 = inlined_call_operand.hbm [shape: f32[8,256], index: 0, kind: input, shape index: {}]   ;;  %s605_s1 = inlined_call_operand.hbm [shape: f32[256,128], index: 1, kind: input, shape index: {}]   ;;  %s606_s2 = inlined_call_operand.vmem [shape: f32[1,128], index: 2, kind: input, shape index: {}]   ;;  %s607_s3 = inlined_call_operand.hbm [shape: f32[128,128], index: 3, kind: input, shape index: {}]   ;;  %s608_s4 = inlined_call_operand.vmem [shape: f32[1,128], index: 4, kind: input, shape index: {}]   ;;  %s609_s5 = inlined_call_operand.hbm [shape: f32[128,128], index: 5, kind: input, shape index: {}]   ;;  %s610_s6 = inlined_call_operand.vmem [shape: f32[1,128], index: 6, kind: input, shape index: {}]   ;;  %s611_s7 = inlined_call_operand.hbm [shape: f32[8,128], index: 7, kind: input, shape index: {}]   ;;  %s612_s8 = inlined_call_operand.hbm [shape: f32[8,128], index: 8, kind: input, shape index: {}]   ;;  %s613_s9 = inlined_call_operand.hbm [shape: f32[8,128], index: 9, kind: output, shape index: {}]  }
   0x1   :  { %15 = vsyncpa [#allocation6], 0 }
   0x2   :  { %16 = vsyncpa [#allocation9], 0 }
   0x3   :  { %17 = vsyncpa [#allocation12], 0  ;;  %s34_s11 = sshll.u32 %s605_s1, 4  ;;  %s35_s11 = int_to_ptr.hbm [resolvable:$true] %s34_s11 }
   0x4   :  { %18 = vsyncpa [#allocation4], 0  ;;  %s515_s12 = smov [#allocation5]   ;;  %s64_s16 = sshll.u32 %s609_s5, 4  ;;  %s65_s16 = int_to_ptr.hbm [resolvable:$true] %s64_s16 }
   0x5   :  { %s36_s13 = sshll.u32 %s515_s12, 4  ;;  %s516_s17 = smov 128   ;;  %s37_s13 = int_to_ptr.vmem [resolvable:$true] %s36_s13 }
   0x6   :  { %s517_s18 = smov 8   ;;  %s518_s19 = smov [#allocation8]  }
   0x7   :  { %42 = dma.hbm_to_vmem [thread:$0]  %s35_s11, 4096, %s37_s13, [#allocation6], %s516_s17, %s516_s17, %s517_s18  }
   0x8   :  { %s66_s20 = sshll.u32 %s518_s19, 4  ;;  %s24_s23 = sshll.u32 %s604_s0, 4  ;;  %s67_s20 = int_to_ptr.vmem [resolvable:$true] %s66_s20  ;;  %s25_s23 = int_to_ptr.hbm [resolvable:$true] %s24_s23 }
   0x9   :  { %72 = dma.hbm_to_vmem [thread:$0]  %s65_s16, 2048, %s67_s20, [#allocation9], %s516_s17, %s516_s17, %s517_s18  }
   0xa   :  { %s49_s25 = sshll.u32 %s607_s3, 4  ;;  %s519_s26 = smov [#allocation2]   ;;  %s50_s25 = int_to_ptr.hbm [resolvable:$true] %s49_s25 }
   0xb   :  { %s26_s27 = sshll.u32 %s519_s26, 4  ;;  %s520_s5 = smov [#allocation7]   ;;  %s27_s27 = int_to_ptr.vmem [resolvable:$true] %s26_s27 }
   0xc   :  { %29 = dma.hbm_to_vmem [thread:$0]  %s25_s23, 256, %s27_s27, [#allocation3]  }
   0xd   :  { %s51_s28 = sshll.u32 %s520_s5, 4  ;;  %s80_s10 = sshll.u32 %s611_s7, 4  ;;  %s52_s28 = int_to_ptr.vmem [resolvable:$true] %s51_s28  ;;  %s81_s10 = int_to_ptr.hbm [resolvable:$true] %s80_s10 }
   0xe   :  { %57 = dma.hbm_to_vmem [thread:$0]  %s50_s25, 2048, %s52_s28, [#allocation6], %s516_s17, %s516_s17, %s517_s18  }
   0xf   :  { %s91_s12 = sshll.u32 %s612_s8, 4  ;;  %s521_s13 = smov [#allocation10]   ;;  %s92_s12 = int_to_ptr.hbm [resolvable:$true] %s91_s12 }
  0x10   :  { %s82_s3 = sshll.u32 %s521_s13, 4  ;;  %s522_s14 = smov [#allocation11]   ;;  %s83_s3 = int_to_ptr.vmem [resolvable:$true] %s82_s3 }
  0x11   :  { %85 = dma.hbm_to_vmem [thread:$0]  %s81_s10, 128, %s83_s3, [#allocation9]  }
  0x12   :  { %s93_s15 = sshll.u32 %s522_s14, 4  ;;  %s94_s15 = int_to_ptr.vmem [resolvable:$true] %s93_s15 }
  0x13   :  { %96 = dma.hbm_to_vmem [thread:$0]  %s92_s12, 128, %s94_s15, [#allocation12]  }
  0x14   :  { %505 = dma.done.wait [#allocation3], 256  }
  0x15   :  { %506 = vsyncadd [#allocation3], 4294967040 }
  0x16   :  { %507 = dma.done.wait [#allocation6], 6144  }
  0x17   :  { %508 = vsyncadd [#allocation6], 4294961152 }
  0x18   :  { %509 = dma.done.wait [#allocation9], 2176  }
  0x19   :  { %510 = vsyncadd [#allocation9], 4294965120 }
  0x1a   :  { %511 = dma.done.wait [#allocation12], 128  }
  0x1b   :  { %512 = vsyncadd [#allocation12], 4294967168  ;;  %v138_v0 = vld [vmem:[#allocation5 + $0x78] sm:$0xff]  ;;  %v137_v1 = vld [vmem:[#allocation5 + $0x70] sm:$0xff]  ;;  %s308_s21 = sshll.u32 %s613_s9, 4  ;;  %s309_s21 = int_to_ptr.hbm [resolvable:$true] %s308_s21 }
  0x1c   :  { %v154_v2 = vld [vmem:[#allocation5 + $0xf8] sm:$0xff]  ;;  %159 = vmatpush.msra.mxu0 %v138_v0  ;;  %v153_v3 = vld [vmem:[#allocation5 + $0xf0] sm:$0xff]  ;;  %v136_v4 = vld [vmem:[#allocation5 + $0x68] sm:$0xff] }
  0x1d   :  { %179 = vmatpush.msra.mxu1 %v154_v2  ;;  %v152_v5 = vld [vmem:[#allocation5 + $0xe8] sm:$0xff]  ;;  %v135_v6 = vld [vmem:[#allocation5 + $0x60] sm:$0xff]  ;;  %v134_v8 = vld [vmem:[#allocation5 + $0x58] sm:$0xff] }
  0x1e   :  { %160 = vmatpush.msra.mxu0 %v137_v1  ;;  %v151_v7 = vld [vmem:[#allocation5 + $0xe0] sm:$0xff]  ;;  %v150_v9 = vld [vmem:[#allocation5 + $0xd8] sm:$0xff]  ;;  %v133_v10 = vld [vmem:[#allocation5 + $0x50] sm:$0xff] }
  0x1f   :  { %180 = vmatpush.msra.mxu1 %v153_v3  ;;  %v149_v11 = vld [vmem:[#allocation5 + $0xd0] sm:$0xff]  ;;  %v132_v12 = vld [vmem:[#allocation5 + $0x48] sm:$0xff]  ;;  %v217_v14 = vld [vmem:[#allocation7 + $0x78] sm:$0xff] }
  0x20   :  { %161 = vmatpush.msra.mxu0 %v136_v4  ;;  %v148_v13 = vld [vmem:[#allocation5 + $0xc8] sm:$0xff]  ;;  %v216_v15 = vld [vmem:[#allocation7 + $0x70] sm:$0xff]  ;;  %v131_v16 = vld [vmem:[#allocation5 + $0x40] sm:$0xff]  ;;  %222 = vmatpush.msra.mxu2 %v217_v14 }
  0x21   :  { %181 = vmatpush.msra.mxu1 %v152_v5  ;;  %v147_v17 = vld [vmem:[#allocation5 + $0xc0] sm:$0xff]  ;;  %v215_v18 = vld [vmem:[#allocation7 + $0x68] sm:$0xff]  ;;  %v130_v19 = vld [vmem:[#allocation5 + $0x38] sm:$0xff] }
  0x22   :  { %162 = vmatpush.msra.mxu0 %v135_v6  ;;  %v146_v20 = vld [vmem:[#allocation5 + $0xb8] sm:$0xff]  ;;  %223 = vmatpush.msra.mxu2 %v216_v15  ;;  %v214_v21 = vld [vmem:[#allocation7 + $0x60] sm:$0xff]  ;;  %v129_v22 = vld [vmem:[#allocation5 + $0x30] sm:$0xff] }
  0x23   :  { %182 = vmatpush.msra.mxu1 %v151_v7  ;;  %v145_v23 = vld [vmem:[#allocation5 + $0xb0] sm:$0xff]  ;;  %v213_v24 = vld [vmem:[#allocation7 + $0x58] sm:$0xff]  ;;  %v128_v25 = vld [vmem:[#allocation5 + $0x28] sm:$0xff] }
  0x24   :  { %163 = vmatpush.msra.mxu0 %v134_v8  ;;  %224 = vmatpush.msra.mxu2 %v215_v18  ;;  %v144_v26 = vld [vmem:[#allocation5 + $0xa8] sm:$0xff]  ;;  %v212_v27 = vld [vmem:[#allocation7 + $0x50] sm:$0xff]  ;;  %v127_v28 = vld [vmem:[#allocation5 + $0x20] sm:$0xff] }
  0x25   :  { %183 = vmatpush.msra.mxu1 %v150_v9  ;;  %v143_v29 = vld [vmem:[#allocation5 + $0xa0] sm:$0xff]  ;;  %v211_v30 = vld [vmem:[#allocation7 + $0x48] sm:$0xff]  ;;  %v126_v31 = vld [vmem:[#allocation5 + $0x18] sm:$0xff] }
  0x26   :  { %164 = vmatpush.msra.mxu0 %v133_v10  ;;  %225 = vmatpush.msra.mxu2 %v214_v21  ;;  %v142_v32 = vld [vmem:[#allocation5 + $0x98] sm:$0xff]  ;;  %v210_v33 = vld [vmem:[#allocation7 + $0x40] sm:$0xff]  ;;  %v125_v34 = vld [vmem:[#allocation5 + $0x10] sm:$0xff] }
  0x27   :  { %184 = vmatpush.msra.mxu1 %v149_v11  ;;  %v141_v35 = vld [vmem:[#allocation5 + $0x90] sm:$0xff]  ;;  %v209_v36 = vld [vmem:[#allocation7 + $0x38] sm:$0xff]  ;;  %v124_v37 = vld [vmem:[#allocation5 + $0x8] sm:$0xff] }
  0x28   :  { %165 = vmatpush.msra.mxu0 %v132_v12  ;;  %226 = vmatpush.msra.mxu2 %v213_v24  ;;  %v140_v38 = vld [vmem:[#allocation5 + $0x88] sm:$0xff]  ;;  %v208_v39 = vld [vmem:[#allocation7 + $0x30] sm:$0xff]  ;;  %v123_v40 = vld [vmem:[#allocation5] sm:$0xff] }
  0x29   :  { %185 = vmatpush.msra.mxu1 %v148_v13  ;;  %v139_v41 = vld [vmem:[#allocation5 + $0x80] sm:$0xff]  ;;  %v121_v42 = vld [vmem:[#allocation2] sm:$0xff]  ;;  %v122_v43 = vld [vmem:[#allocation2 + $0x8] sm:$0xff] }
  0x2a   :  { %166 = vmatpush.msra.mxu0 %v131_v16  ;;  %227 = vmatpush.msra.mxu2 %v212_v27  ;;  %v207_v44 = vld [vmem:[#allocation7 + $0x28] sm:$0xff]  ;;  %v206_v45 = vld [vmem:[#allocation7 + $0x20] sm:$0xff]  ;;  %v205_v46 = vld [vmem:[#allocation7 + $0x18] sm:$0xff]  ;;  %v286_v16 = vlaneseq }
  0x2b   :  { %186 = vmatpush.msra.mxu1 %v147_v17  ;;  %v204_v47 = vld [vmem:[#allocation7 + $0x10] sm:$0xff]  ;;  %v203_v48 = vld [vmem:[#allocation7 + $0x8] sm:$0xff]  ;;  %v202_v49 = vld [vmem:[#allocation7] sm:$0xff] }
  0x2c   :  { %167 = vmatpush.msra.mxu0 %v130_v19  ;;  %228 = vmatpush.msra.mxu2 %v211_v30  ;;  %v260_v50 = vld [vmem:[#allocation8 + $0x78] sm:$0xff]  ;;  %v259_v51 = vld [vmem:[#allocation8 + $0x70] sm:$0xff]  ;;  %v258_v52 = vld [vmem:[#allocation8 + $0x68] sm:$0xff]  ;;  %v287_v18 = vand.u32 127, %v286_v16 }
  0x2d   :  { %187 = vmatpush.msra.mxu1 %v146_v20  ;;  %265 = vmatpush.msra.mxu3 %v260_v50  ;;  %v257_v53 = vld [vmem:[#allocation8 + $0x60] sm:$0xff]  ;;  %v256_v54 = vld [vmem:[#allocation8 + $0x58] sm:$0xff]  ;;  %v255_v55 = vld [vmem:[#allocation8 + $0x50] sm:$0xff] }
  0x2e   :  { %168 = vmatpush.msra.mxu0 %v129_v22  ;;  %229 = vmatpush.msra.mxu2 %v210_v33  ;;  %v254_v56 = vld [vmem:[#allocation8 + $0x48] sm:$0xff]  ;;  %v253_v57 = vld [vmem:[#allocation8 + $0x40] sm:$0xff]  ;;  %v252_v58 = vld [vmem:[#allocation8 + $0x38] sm:$0xff]  ;;  %vm288_vm0 = vcmp.lt.s32.totalorder %v287_v18, 10 }
  0x2f   :  { %188 = vmatpush.msra.mxu1 %v145_v23  ;;  %266 = vmatpush.msra.mxu3 %v259_v51  ;;  %v251_v59 = vld [vmem:[#allocation8 + $0x30] sm:$0xff]  ;;  %v250_v60 = vld [vmem:[#allocation8 + $0x28] sm:$0xff]  ;;  %v249_v62 = vld [vmem:[#allocation8 + $0x20] sm:$0xff] }
  0x30   :  { %169 = vmatpush.msra.mxu0 %v128_v25  ;;  %230 = vmatpush.msra.mxu2 %v209_v36  ;;  %v330_v61 = vld [vmem:[%s606_s2] ss:$0 sm:$0xff]  ;;  %v200_v3 = vld [vmem:[#allocation10] sm:$0xff]  ;;  %v248_v6 = vld [vmem:[#allocation8 + $0x18] sm:$0xff] }
  0x31   :  { %189 = vmatpush.msra.mxu1 %v144_v26  ;;  %267 = vmatpush.msra.mxu3 %v258_v52  ;;  %v247_v7 = vld [vmem:[#allocation8 + $0x10] sm:$0xff]  ;;  %v246_v8 = vld [vmem:[#allocation8 + $0x8] sm:$0xff]  ;;  %v245_v9 = vld [vmem:[#allocation8] sm:$0xff] }
  0x32   :  { %170 = vmatpush.msra.mxu0 %v127_v28  ;;  %231 = vmatpush.msra.mxu2 %v208_v39  ;;  %v331_v10 = vld [vmem:[%s608_s4] ss:$0 sm:$0xff]  ;;  %v243_v13 = vld [vmem:[#allocation11] sm:$0xff]  ;;  %s523_s4 = smov [#allocation13]  }
  0x33   :  { %190 = vmatpush.msra.mxu1 %v143_v29  ;;  %268 = vmatpush.msra.mxu3 %v257_v53  ;;  %v332_v17 = vld [vmem:[%s610_s6] ss:$0 sm:$0xff]  ;;  %s306_s19 = sshll.u32 %s523_s4, 4  ;;  %s307_s19 = int_to_ptr.vmem [resolvable:$true] %s306_s19 }
  0x34   :  { %171 = vmatpush.msra.mxu0 %v126_v31  ;;  %232 = vmatpush.msra.mxu2 %v207_v44 }
  0x35   :  { %191 = vmatpush.msra.mxu1 %v142_v32  ;;  %269 = vmatpush.msra.mxu3 %v256_v54 }
  0x36   :  { %172 = vmatpush.msra.mxu0 %v125_v34  ;;  %233 = vmatpush.msra.mxu2 %v206_v45 }
  0x37   :  { %192 = vmatpush.msra.mxu1 %v141_v35  ;;  %270 = vmatpush.msra.mxu3 %v255_v55 }
  0x38   :  { %173 = vmatpush.msra.mxu0 %v124_v37  ;;  %234 = vmatpush.msra.mxu2 %v205_v46 }
  0x39   :  { %193 = vmatpush.msra.mxu1 %v140_v38  ;;  %271 = vmatpush.msra.mxu3 %v254_v56 }
  0x3a   :  { %174 = vmatpush.msra.mxu0 %v123_v40  ;;  %235 = vmatpush.msra.mxu2 %v204_v47 }
  0x3b   :  { %194 = vmatpush.msra.mxu1 %v139_v41  ;;  %175 = vmatmul.f32.vlgmr.msra.gmra.mxu0 %v121_v42 }
  0x3c   :  { %195 = vmatmul.f32.vlgmr.msra.gmra.mxu1 %v122_v43  ;;  %236 = vmatpush.msra.mxu2 %v203_v48 }
  0x3d   :  { %272 = vmatpush.msra.mxu3 %v253_v57 }
  0x3e   :  { %237 = vmatpush.msra.mxu2 %v202_v49 }
  0x3f   :  { %273 = vmatpush.msra.mxu3 %v252_v58 }
  0x41   :  { %274 = vmatpush.msra.mxu3 %v251_v59 }
  0x43   :  { %275 = vmatpush.msra.mxu3 %v250_v60 }
  0x45   :  { %276 = vmatpush.msra.mxu3 %v249_v62 }
  0x47   :  { %277 = vmatpush.msra.mxu3 %v248_v6 }
  0x49   :  { %278 = vmatpush.msra.mxu3 %v247_v7 }
  0x4b   :  { %279 = vmatpush.msra.mxu3 %v246_v8 }
  0x4d   :  { %280 = vmatpush.msra.mxu3 %v245_v9 }
  0xb8   :  { %v176_v63 = vpop.f32.mrf.mxu0 }
  0xb9   :  { %v196_v0 = vpop.f32.mrf.mxu1  ;;  %v177_v1 = vadd.f32 %v330_v61, %v176_v63 }
  0xbb   :  { %v197_v2 = vadd.f32 %v196_v0, %v177_v1 }
  0xbd   :  { %v199_v4 = vmax.f32 %v197_v2, 0.0 }
  0xbf   :  { %v201_v5 = vmul.f32 %v200_v3, %v199_v4 }
  0xc1   :  { %238 = vmatmul.f32.vlgmr.msra.gmra.mxu2 %v201_v5 }
 0x144   :  { %v239_v11 = vpop.f32.mrf.mxu2 }
 0x145   :  { %v240_v12 = vadd.f32 %v331_v10, %v239_v11 }
 0x147   :  { %v242_v14 = vmax.f32 %v240_v12, 0.0 }
 0x149   :  { %v244_v15 = vmul.f32 %v243_v13, %v242_v14 }
 0x14b   :  { %281 = vmatmul.f32.vlgmr.msra.gmra.mxu3 %v244_v15 }
 0x1ce   :  { %v282_v19 = vpop.f32.mrf.mxu3 }
 0x1cf   :  { %v283_v20 = vadd.f32 %v332_v17, %v282_v19 }
 0x1d1   :  { %v285_v21 = vmax.f32 %v283_v20, 0.0 }
 0x1d3   :  { %v289_v22 = vsel %vm288_vm0, %v285_v21, -inf }
 0x1d4   :  { %290 = vmax.xlane.f32.xlu0 %v289_v22 }
 0x247   :  { %v291_v23 = vpop.xlane.xlu0 %290 }
 0x248   :  { %v292_v24 = vsub.f32 %v289_v22, %v291_v23 }
 0x24a   :  { %v293_v25 = vmul.f32 1.442695, %v292_v24 }
 0x24c   :  { %333 = vpow2.f32 %v293_v25 }
 0x252   :  { %v334_v26 = vpop.eup %333 }
 0x253   :  { %295 = vadd.xlane.f32.xlu0 %v334_v26 }
 0x2c6   :  { %v296_v27 = vpop.xlane.xlu0 %295 }
 0x2c7   :  { %335 = vlog2.f32 %v296_v27 }
 0x2cd   :  { %v336_v28 = vpop.eup %335 }
 0x2ce   :  { %v298_v29 = vmul.f32 0.6931472, %v336_v28 }
 0x2d0   :  { %v299_v30 = vsub.f32 %v292_v24, %v298_v29 }
 0x2d2   :  { %300 = vst [vmem:[#allocation13] sm:$0xff] %v299_v30 }
 0x2d3   :  { %311 = dma.vmem_to_hbm [thread:$0]  %s307_s19, 128, %s309_s21, [#allocation4]  }
 0x2d4   :  { %513 = dma.done.wait [#allocation4], 128  }
 0x2d5   :  { %514 = vsyncadd [#allocation4], 4294967168 }
 0x2d6   :  { %316 = vsyncpa [#allocation3], 1 }
 0x2d7   :  { %317 = vsyncpa [#allocation6], 1 }
 0x2d8   :  { %318 = vsyncpa [#allocation9], 1 }
 0x2d9   :  { %319 = vsyncpa [#allocation12], 1 }
 0x2da   :  { %320 = vsyncpa [#allocation4], 1 }

</bundles_post_ra>
